<compile_context>
chip_gen: v5e
topology: v5e:2x2
jax: 0.10.0
libtpu: 0.0.40
codegen_flags: <defaults>
</compile_context>

<pallas_src>
import jax
import jax.numpy as jnp
from jax import lax
from jax.experimental import pallas as pl
from jax.experimental.pallas import tpu as pltpu


def _round_up(a, b):
    return ((a + b - 1) // b) * b


def _vmem_capacity_bytes():
    try:
        return int(pltpu.get_tpu_info().vmem_capacity_bytes)
    except Exception:
        return 64 * 1024 * 1024        # conservative fallback: v7x per-TC VMEM


def _vmem_limit(needed, cap):
    return int(min(0.7 * cap, max(needed, 16 * 1024 * 1024)))


def _choose_hw_tile(HW, C, cap):
    """Lane-dense HW tile: generation-aware max size, minimal padding waste."""
    if cap <= 80 * 1024 * 1024:                    # v7x-class: 64 MiB per TC
        max_tile = 256 if C >= 1536 else 512
    else:                                          # v5e / v6e: 128 MiB
        max_tile = 1024
    if HW <= max_tile:
        t = _round_up(HW, 128)
        return t, t
    cands = [c for c in (1024, 896, 768, 640, 512, 384, 256) if c <= max_tile]
    best_t, best_pad = cands[0], None
    for t in cands:                                # prefer larger tile on ties
        pad = _round_up(HW, t) - HW
        if best_pad is None or pad < best_pad:
            best_t, best_pad = t, pad
    return best_t, _round_up(HW, best_t)


def _attention_from_gram(g, beta):
    # softmax(rowmax(G) - G) == exp(rowmin(G) - G) / sum(exp(rowmin(G) - G)):
    # shift-invariant, exponent <= 0 (stable), single XLU row-reduce for the
    # shift.  beta is folded in so pass 2 is just (beta*P) @ A + A.
    z = jnp.min(g, axis=-1, keepdims=True) - g
    e = jnp.exp(z)
    p = e / jnp.sum(e, axis=-1, keepdims=True)
    return beta * p


# ----------------------------------------------------------------------------
# Pass 1: accumulate G[b] = A[b] @ A[b]^T into the resident output block over
#         HW tiles, then finalize it in place to beta * softmax(rowmax(G) - G).
# ----------------------------------------------------------------------------
def _gram_softmax_kernel(x_ref, beta_ref, p_ref):
    # x_ref: (1, C, hw_tile) native dtype; beta_ref: (1,) f32 SMEM;
    # p_ref: (1, C, C) f32 output block (VMEM-resident across the hw axis).
    k = pl.program_id(1)

    @pl.when(k == 0)
    def _():
        p_ref[...] = jnp.zeros_like(p_ref)

    a = x_ref[0]                                   # native dtype -> native MXU
    # NT contraction (axis 1 of both operands); f32 accumulation on the MXU.
    p_ref[0] += lax.dot_general(
        a, a,
        dimension_numbers=(((1,), (1,)), ((), ())),
        preferred_element_type=jnp.float32)

    @pl.when(k == pl.num_programs(1) - 1)
    def _():
        p_ref[0] = _attention_from_gram(p_ref[0], beta_ref[0])


# ----------------------------------------------------------------------------
# Pass 2: out_tile = (beta*P) @ A_tile + A_tile   (softmax already hoisted).
# ----------------------------------------------------------------------------
def _apply_kernel(x_ref, p_ref, o_ref):
    # x_ref: (1, C, hw_tile) native; p_ref: (1, C, C) f32; o_ref like x_ref.
    a = x_ref[0]
    p = p_ref[0]
    if a.dtype != jnp.float32:                     # bf16/f16: native MXU path
        p = p.astype(a.dtype)
    fe = jnp.dot(p, a, preferred_element_type=jnp.float32)
    o_ref[0] = (fe + a.astype(jnp.float32)).astype(o_ref.dtype)


# ----------------------------------------------------------------------------
# Fused single-pass variant: one grid step per batch, A resident in VMEM.
# ----------------------------------------------------------------------------
def _fused_kernel(x_ref, beta_ref, o_ref):
    a = x_ref[0]                                   # (C, hw_pad) native dtype
    g = lax.dot_general(
        a, a,
        dimension_numbers=(((1,), (1,)), ((), ())),
        preferred_element_type=jnp.float32)
    p = _attention_from_gram(g, beta_ref[0])
    if a.dtype != jnp.float32:
        p = p.astype(a.dtype)
    fe = jnp.dot(p, a, preferred_element_type=jnp.float32)
    o_ref[0] = (fe + a.astype(jnp.float32)).astype(o_ref.dtype)


# ----------------------------------------------------------------------------
# Wrapper
# ----------------------------------------------------------------------------
def channel_attention_forward(x, beta, *, mode="auto", lane_tile=None):
    """x: (B, C, H, W) float (f32 / bf16); beta: scalar / (1,) parameter.

    mode: "auto" | "fused" | "two_pass".  lane_tile: optional HW tile override
    (multiple of 128) for the two-pass path.
    """
    B, C, H, W = x.shape
    HW = H * W
    in_dtype = x.dtype
    isize = jnp.dtype(in_dtype).itemsize
    cap = _vmem_capacity_bytes()

    beta_arr = jnp.asarray(beta, jnp.float32).reshape(1)
    hw_pad_min = _round_up(HW, 128)

    # Fused footprint: double-buffered x & out blocks + f32 fe/residual temps
    # + (C, C) attention temporaries + slack.
    fused_need = (4 * C * hw_pad_min * isize + 2 * C * hw_pad_min * 4
                  + 4 * C * C * 4 + (2 << 20))
    use_fused = (mode == "fused") or (mode == "auto" and fused_need <= 0.5 * cap)

    if use_fused:
        hw_pad = hw_pad_min
        x2 = x.reshape(B, C, HW)
        if hw_pad != HW:
            # Zero padding is exact for A @ A^T; padded columns are dropped.
            x2 = jnp.pad(x2, ((0, 0), (0, 0), (0, hw_pad - HW)))
        out_p = pl.pallas_call(
            _fused_kernel,
            out_shape=jax.ShapeDtypeStruct((B, C, hw_pad), in_dtype),
            grid=(B,),
            in_specs=[
                pl.BlockSpec((1, C, hw_pad), lambda b: (b, 0, 0)),
                pl.BlockSpec(memory_space=pltpu.MemorySpace.SMEM),
            ],
            out_specs=pl.BlockSpec((1, C, hw_pad), lambda b: (b, 0, 0)),
            compiler_params=pltpu.CompilerParams(
                dimension_semantics=("parallel",),
                vmem_limit_bytes=_vmem_limit(fused_need, cap)),
            cost_estimate=pl.CostEstimate(
                flops=int(4 * B * C * C * hw_pad + 8 * B * C * C),
                transcendentals=int(B * C * C),
                bytes_accessed=int(2 * B * C * hw_pad * isize)),
        )(x2, beta_arr)
        if hw_pad != HW:
            out_p = out_p[:, :, :HW]
        return out_p.reshape(B, C, H, W)

    # ----------------------- two-pass path -------------------------------
    if lane_tile is not None:
        hw_tile = int(lane_tile)
        assert hw_tile % 128 == 0, "lane_tile must be a multiple of 128"
        hw_tile = min(hw_tile, hw_pad_min)
    else:
        hw_tile, _ = _choose_hw_tile(HW, C, cap)
        hw_tile = min(hw_tile, hw_pad_min)
    hw_pad = _round_up(HW, hw_tile)
    n_hw = hw_pad // hw_tile

    x2 = x.reshape(B, C, HW)
    if hw_pad != HW:
        x2 = jnp.pad(x2, ((0, 0), (0, 0), (0, hw_pad - HW)))

    p1_need = (2 * C * hw_tile * isize + 2 * C * C * 4
               + 4 * C * C * 4 + (2 << 20))
    p2_need = (4 * C * hw_tile * isize + 2 * C * C * 4
               + 2 * C * hw_tile * 4 + (2 << 20))

    # --- pass 1: Gram accumulation + hoisted softmax (beta folded) --------
    attn = pl.pallas_call(
        _gram_softmax_kernel,
        out_shape=jax.ShapeDtypeStruct((B, C, C), jnp.float32),
        grid=(B, n_hw),
        in_specs=[
            pl.BlockSpec((1, C, hw_tile), lambda b, k: (b, 0, k)),
            pl.BlockSpec(memory_space=pltpu.MemorySpace.SMEM),
        ],
        out_specs=pl.BlockSpec((1, C, C), lambda b, k: (b, 0, 0)),
        compiler_params=pltpu.CompilerParams(
            dimension_semantics=("parallel", "arbitrary"),
            vmem_limit_bytes=_vmem_limit(p1_need, cap)),
        cost_estimate=pl.CostEstimate(
            flops=int(2 * B * C * C * hw_pad + 8 * B * C * C),
            transcendentals=int(B * C * C),
            bytes_accessed=int(B * C * hw_pad * isize + B * C * C * 4)),
    )(x2, beta_arr)

    # --- pass 2: (beta*P) @ A_tile + residual, both grid axes parallel ----
    out_p = pl.pallas_call(
        _apply_kernel,
        out_shape=jax.ShapeDtypeStruct((B, C, hw_pad), in_dtype),
        grid=(B, n_hw),
        in_specs=[
            pl.BlockSpec((1, C, hw_tile), lambda b, t: (b, 0, t)),
            pl.BlockSpec((1, C, C), lambda b, t: (b, 0, 0)),
        ],
        out_specs=pl.BlockSpec((1, C, hw_tile), lambda b, t: (b, 0, t)),
        compiler_params=pltpu.CompilerParams(
            dimension_semantics=("parallel", "parallel"),
            vmem_limit_bytes=_vmem_limit(p2_need, cap)),
        cost_estimate=pl.CostEstimate(
            flops=int(2 * B * C * C * hw_pad + 2 * B * C * hw_pad),
            transcendentals=0,
            bytes_accessed=int(2 * B * C * hw_pad * isize + B * C * C * 4)),
    )(x2, attn)

    if hw_pad != HW:
        out_p = out_p[:, :, :HW]
    return out_p.reshape(B, C, H, W)


# ----------------------------------------------------------------------------
# Pure-JAX reference matching the PyTorch forward.
# ----------------------------------------------------------------------------
def channel_attention_reference(x, beta):
    B, C, H, W = x.shape
    a = x.reshape(B, C, H * W).astype(jnp.float32)
    att = jnp.einsum('bcd,bed->bce', a, a, precision=lax.Precision.HIGHEST)
    att_new = jnp.max(att, axis=-1, keepdims=True) - att
    p = jax.nn.softmax(att_new, axis=-1)
    fe = jnp.einsum('bce,bed->bcd', p, a, precision=lax.Precision.HIGHEST)
    out = jnp.asarray(beta, jnp.float32).reshape(1, 1, 1) * fe + a
    return out.reshape(B, C, H, W).astype(x.dtype)


if __name__ == "__main__":
    key = jax.random.PRNGKey(0)
    kx, kb = jax.random.split(key)

    B, C, H, W = 2, 4, 16, 16
    x = jax.random.normal(kx, (B, C, H, W), dtype=jnp.float32)
    # nn.Parameter(torch.zeros(1)) is learnable; use a nonzero value so the
    # attention path is actually exercised by the correctness check.
    beta = jax.random.normal(kb, (1,), dtype=jnp.float32) * 0.5

    ref = channel_attention_reference(x, beta)

    # auto path (fused single-pass at this size), f32 bit-comparable arithmetic
    out = jax.block_until_ready(channel_attention_forward(x, beta))
    assert out.shape == x.shape and out.dtype == x.dtype
    assert jnp.allclose(out, ref, atol=1e-3, rtol=1e-3), "fused f32 mismatch"

    # explicit two-pass path with a multi-tile HW reduction (exercises the
    # in-place Gram accumulation + hoisted-softmax finalize and pass 2)
    out2 = jax.block_until_ready(
        channel_attention_forward(x, beta, mode="two_pass", lane_tile=128))
    assert jnp.allclose(out2, ref, atol=1e-3, rtol=1e-3), "two-pass f32 mismatch"

    # bf16 path: native-dtype MXU operands with f32 accumulation
    xb = x.astype(jnp.bfloat16)
    refb = channel_attention_reference(xb, beta).astype(jnp.float32)
    outb = jax.block_until_ready(channel_attention_forward(xb, beta))
    assert outb.dtype == jnp.bfloat16
    assert jnp.allclose(outb.astype(jnp.float32), refb, atol=5e-2, rtol=5e-2), \
        "fused bf16 mismatch"
    outb2 = jax.block_until_ready(
        channel_attention_forward(xb, beta, mode="two_pass", lane_tile=128))
    assert jnp.allclose(outb2.astype(jnp.float32), refb, atol=5e-2, rtol=5e-2), \
        "two-pass bf16 mismatch"

    print("KERNEL_OK")
</pallas_src>

<mosaic_0001>
module attributes {stable_mosaic.version = 11 : i64} {
  func.func @_fused_kernel(%arg0: i32, %arg1: memref<1x4x256xf32, #tpu.memory_space<vmem>>, %arg2: memref<1xf32, #tpu.memory_space<smem>>, %arg3: memref<1x4x256xf32, #tpu.memory_space<vmem>>) attributes {dimension_semantics = [#tpu.dimension_semantics<parallel>], iteration_bounds = array<i64: 2>, scalar_prefetch = 0 : i64, scratch_operands = 0 : i64, tpu.core_type = #tpu.core_type<tc>, window_params = [{transform_indices = @transform_0, window_bounds = array<i64: 1, 4, 256>}, {transform_indices = @transform_1, window_bounds = array<i64: 1>}, {transform_indices = @transform_2, window_bounds = array<i64: 1, 4, 256>}]} {
    %c0 = arith.constant 0 : index
    %c0_0 = arith.constant 0 : index
    %c0_1 = arith.constant 0 : index
    %0 = vector.load %arg1[%c0, %c0_0, %c0_1] : memref<1x4x256xf32, #tpu.memory_space<vmem>>, vector<1x4x256xf32>
    %1 = vector.shape_cast %0 : vector<1x4x256xf32> to vector<4x256xf32>
    %cst = arith.constant dense<0.000000e+00> : vector<4x4xf32>
    %2 = tpu.matmul %1, %1, %cst {dimension_numbers = #tpu.dot_dimension_numbers<[1], [1], [0], [0], [0, 0, 1, 0], [], []>} : vector<4x256xf32>, vector<4x256xf32>, vector<4x4xf32> -> vector<4x4xf32>
    %c0_2 = arith.constant 0 : index
    %3 = memref.load %arg2[%c0_2] : memref<1xf32, #tpu.memory_space<smem>>
    %cst_3 = arith.constant dense<0x7F800000> : vector<4xf32>
    %4 = vector.multi_reduction <minimumf>, %2, %cst_3 [1] : vector<4x4xf32> to vector<4xf32>
    %5 = vector.shape_cast %4 : vector<4xf32> to vector<4x1xf32>
    %6 = vector.broadcast %5 : vector<4x1xf32> to vector<4x4xf32>
    %7 = arith.subf %6, %2 : vector<4x4xf32>
    %8 = math.exp %7 : vector<4x4xf32>
    %cst_4 = arith.constant dense<0.000000e+00> : vector<4xf32>
    %9 = vector.multi_reduction <add>, %8, %cst_4 [1] : vector<4x4xf32> to vector<4xf32>
    %10 = vector.shape_cast %9 : vector<4xf32> to vector<4x1xf32>
    %11 = vector.broadcast %10 : vector<4x1xf32> to vector<4x4xf32>
    %12 = arith.divf %8, %11 : vector<4x4xf32>
    %13 = vector.broadcast %3 : f32 to vector<4x4xf32>
    %14 = arith.mulf %13, %12 : vector<4x4xf32>
    %cst_5 = arith.constant dense<0.000000e+00> : vector<4x256xf32>
    %15 = tpu.matmul %14, %1, %cst_5 {dimension_numbers = #tpu.dot_dimension_numbers<[1], [0], [0], [1], [0, 0, 1, 1], [], []>} : vector<4x4xf32>, vector<4x256xf32>, vector<4x256xf32> -> vector<4x256xf32>
    %16 = arith.addf %15, %1 : vector<4x256xf32>
    %c0_6 = arith.constant 0 : index
    %c0_7 = arith.constant 0 : index
    %c0_8 = arith.constant 0 : index
    %17 = vector.load %arg3[%c0_6, %c0_7, %c0_8] : memref<1x4x256xf32, #tpu.memory_space<vmem>>, vector<1x4x256xf32>
    %18 = vector.shape_cast %17 : vector<1x4x256xf32> to vector<4x256xf32>
    %19 = vector.shape_cast %16 : vector<4x256xf32> to vector<1x4x256xf32>
    tpu.vector_store %arg3[%c0_6, %c0_7, %c0_8], %19 {strides = array<i32>} : memref<1x4x256xf32, #tpu.memory_space<vmem>>, vector<1x4x256xf32>,
    return
  }
  func.func @transform_0(%arg0: i32) -> (i32, i32, i32) {
    %c0_i32 = arith.constant 0 : i32
    %c0_i32_0 = arith.constant 0 : i32
    %c0_i32_1 = arith.constant 0 : i32
    return %arg0, %c0_i32, %c0_i32_0 : i32, i32, i32
  }
  func.func @transform_1(%arg0: i32) -> i32 {
    %c0_i32 = arith.constant 0 : i32
    %c0_i32_0 = arith.constant 0 : i32
    return %c0_i32 : i32
  }
  func.func @transform_2(%arg0: i32) -> (i32, i32, i32) {
    %c0_i32 = arith.constant 0 : i32
    %c0_i32_0 = arith.constant 0 : i32
    %c0_i32_1 = arith.constant 0 : i32
    return %arg0, %c0_i32, %c0_i32_0 : i32, i32, i32
  }
}

</mosaic_0001>

<bundles_post_ra>
// kernel: tpu_custom_call.1
= control target key start
LH: loop header
LB: loop body
LE: loop exit
PB: predicated region body
PF: predicated region fallthrough
CT: control target
= control target key end

     0   :  { %s713_s0 = inlined_call_operand.hbm [shape: f32[2,4,256], index: 0, kind: input, shape index: {}]   ;;  %s714_s1 = inlined_call_operand.<no memory space> [shape: f32[1], index: 1, kind: input, shape index: {}]   ;;  %s715_s2 = inlined_call_operand.hbm [shape: f32[2,4,256], index: 2, kind: output, shape index: {}]  }
   0x1   :  { %7 = sst [smem:[#allocation2]] %s714_s1 }
   0x2   :  { %8 = vsyncpa [#allocation4], 0 }
   0x3   :  { %10 = vsyncpa [#allocation4 + $0x1], 0 }
   0x4   :  { %11 = vsyncpa [#allocation5], 0 }
   0x5   :  { %13 = vsyncpa [#allocation5 + $0x1], 0  ;;  %s579_s11 = smov 0   ;;  %s581_s12 = smov 0  }
   0x6   :  { %s583_s13 = smov 0   ;;  %s585_s14 = smov 0  }
   0x7 LB: > { %s600_s1 = sadd.s32 4294967295, %s559_s14   ;;  %s393_s15 = sadd.s32 4294967294, %s559_s14   ;;  %s559_s14 = sphi %s585_s14, %s725_s14   ;;  %s555_s13 = sphi %s583_s13, %s724_s13   ;;  %s551_s12 = sphi %s581_s12, %s723_s12   ;;  %s547_s11 = sphi %s579_s11, %s722_s11  }
   0x8   : > { %s604_s16 = sadd.s32 1, %s559_s14   ;;  %s26_s17 = sadd.s32 1, %s555_s13 }
   0x9   : > { %s23_s18 = ssub.s32 %s559_s14, %s604_s16  ;;  %p33_p0 = scmp.ne.s32.totalorder %s555_s13, %s551_s12 }
   0xa   : > { %p24_p1 = scmp.eq.s32.totalorder %s23_s18, 0  ;;  %p34_p2 = scmp.eq.s32.totalorder %s559_s14, 0 }
   0xb   : > { %p39_p3 = scmp.ne.s32.totalorder %s551_s12, %s547_s11  ;;  %p40_p4 = scmp.eq.s32.totalorder %s600_s1, 0 }
   0xc   : > { %s616_s19 = scalar_select %p24_p1, %s555_s13, %s26_s17  }
   0xd   : > { %p618_p5 = por %p34_p2, %p33_p0  ;;  %p622_p6 = por %p40_p4, %p39_p3 }
   0xe   : > { %p84_p7 = scmp.eq.s32.totalorder %s600_s1, 1  ;;  %p90_p8 = scmp.eq.s32.totalorder %s393_s15, 1 }
   0xf   : > { %p425_p10 = scmp.lt.s32.totalorder %s559_s14, 2  ;;  %s113_s24 = sand.u32 1, %s555_s13  }
  0x10   : > { %p629_p11 = por %p84_p7, %p33_p0  ;;  %p633_p12 = por %p90_p8, %p39_p3 }
  0x11   : > { %s411_s25 = sshll.u32 %s559_s14, 3  ;;  %s396_s26 = sshll.u32 %s113_s24, 3 }
  0x12   : > { %s122_s29 = scalar_lea.hbm %s713_s0, %s411_s25  ;;  %s117_s3 = scalar_lea.vmem [#allocation3], %s396_s26 }
  0x13   : > { %s124_s30 = sshll.u32 %s122_s29, 4  ;;  %s126_s4 = sshll.u32 %s117_s3, 4  ;;  %s125_s30 = int_to_ptr.hbm [resolvable:$true] %s124_s30  ;;  %s127_s4 = int_to_ptr.vmem [resolvable:$true] %s126_s4 }
  0x14   : > { %p644_p13 = pnand %p425_p10, %p618_p5  ;;  %p399_p0 = scmp.ge.s32.totalorder %s559_s14, 1 }
  0x15   : > { %p131_p1 = scmp.lt.s32.totalorder %s559_s14, 3  ;;  %s114_s6 = scalar_lea.sflag [#allocation4], %s113_s24 }
  0x16   : > { %s463_s7 = sshra.s32 %s125_s30, 4  ;;  %p467_p3 = pneg %p644_p13  ;;  %s464_s7 = int_to_ptr.hbm [resolvable:$true] %s463_s7 }
  0x17   : > { %s465_s8 = scalar_lea.hbm %s464_s7, 8  ;;  %s470_s15 = scalar_lea.hbm %s713_s0, 16 }
  0x18   : > { %p466_p2 = scmp.ne.s32.totalorder %s464_s7, %s465_s8  ;;  %p471_p5 = scmp.lt.s32.totalorder %s464_s7, %s713_s0 }
  0x19   : > { %p472_p8 = scmp.lt.s32.totalorder %s470_s15, %s465_s8 }
  0x1a   : > { %p468_p4 = pnand %p467_p3, %p466_p2 }
  0x1b   : > { %p473_p10 = por %p472_p8, %p471_p5 }
  0x1c   : > { %p469_p7 = pneg %p468_p4 }
  0x1e   : > { %p474_p9 = pnand %p473_p10, %p469_p7 }
  0x20   : > { %477 = shalt.err (!%p474_p9)
}
  0x21   : > { %420 = dma.hbm_to_vmem [thread:$0]  (!%p644_p13), %s125_s30, 128, %s127_s4, %s114_s6  }
  0x22   : > { %p132_p2 = pnand %p399_p0, %p131_p1 }
  0x23   : > { %s665_s20 = sand.u32 (!%p132_p2), 1, %s551_s12  }
  0x24   : > { %135 = sbr.rel (%p132_p2) target bundleno = 596 (0x254), region = 28  ;;  %s400_s24 = sshll.u32 (!%p132_p2), %s665_s20, 3 }
  0x25   : > { %s138_s25 = scalar_lea.sflag (!%p132_p2), [#allocation4], %s665_s20  ;;  %s141_s26 = scalar_lea.vmem (!%p132_p2), [#allocation3], %s400_s24 }
  0x29   : > { %538 = dma.done.wait (%p622_p6), %s138_s25, 128  }
  0x2a   : > { %540 = vsyncadd (%p622_p6), %s138_s25, 4294967168  ;;  %v163_v0 = vld [vmem:[%s141_s26] sm:$0xff]  ;;  %vm216_vm0 = vcmask 27648   ;;  %vm255_vm1 = vcmask 1043456   ;;  %s215_s21 = sld [smem:[#allocation2]]  ;;  %vm251_vm6 = vcmask 31744  }
  0x2b   : > { %165 = vst [vmem:[#allocation1] ss:$2 sm:$0xff] %v163_v0  ;;  %s412_s27 = sshll.u32 %s600_s1, 3  ;;  %s162_s3 = scalar_lea.vmem [#allocation6], %s400_s24 }
  0x2c   : > { %s318_s30 = scalar_lea.hbm %s715_s2, %s412_s27  ;;  %s320_s4 = sshll.u32 %s162_s3, 4  ;;  %s321_s4 = int_to_ptr.vmem [resolvable:$true] %s320_s4 }
  0x2d   : > { %s322_s5 = sshll.u32 %s318_s30, 4  ;;  %s307_s1 = scalar_lea.sflag [#allocation5], %s665_s20  ;;  %s323_s5 = int_to_ptr.hbm [resolvable:$true] %s322_s5 }
  0x2e   : > { %s507_s6 = sshra.s32 %s323_s5, 4  ;;  %s513_s10 = scalar_lea.hbm %s715_s2, 16  ;;  %s508_s6 = int_to_ptr.hbm [resolvable:$true] %s507_s6 }
  0x2f   : > { %s509_s7 = scalar_lea.hbm %s508_s6, 8  ;;  %p514_p0 = scmp.lt.s32.totalorder %s508_s6, %s715_s2 }
  0x30   : > { %v241_v27 = vstv %s215_s21  ;;  %p510_p6 = scmp.ne.s32.totalorder %s508_s6, %s509_s7  ;;  %p515_p1 = scmp.lt.s32.totalorder %s513_s10, %s509_s7 }
  0x32   : > { %v166_v1 = vld.sshfl [vmem:[#allocation1] sm:$0xff pattern:$0x75316420]  ;;  %v167_v2 = vld.sshfl [vmem:[#allocation1 + $0x8] sm:$0xff pattern:$0x75316420]  ;;  %p511_p9 = pnand %p510_p6, %p629_p11  ;;  %p516_p3 = por %p515_p1, %p514_p0 }
  0x33   : > { %170 = vst [vmem:[#allocation1] ss:$2 sm:$0xff] %v163_v0 }
  0x34   : > { %p512_p13 = pneg %p511_p9 }
  0x36   : > { %p517_p4 = pnand %p516_p3, %p512_p13 }
  0x3a   : > { %v171_v3 = vld.sshfl [vmem:[#allocation1] sm:$0xff pattern:$0x75316420]  ;;  %v172_v4 = vld.sshfl [vmem:[#allocation1 + $0x8] sm:$0xff pattern:$0x75316420] }
  0x3b   : > { %190 = vmatpush.xpose.msra.mxu0 %v171_v3  ;;  %210 = vmatpush.xpose.msra.mxu1 %v172_v4  ;;  %243 = vst [vmem:[#allocation1] ss:$2 sm:$0xff] %v163_v0 }
  0x3e   : > { %191 = vmatmul.f32.vlgmr.msra.gmra.mxu0 %v166_v1  ;;  %211 = vmatmul.f32.vlgmr.msra.gmra.mxu1 %v167_v2 }
  0x42   : > { %v244_v14 = vld.sshfl [vmem:[#allocation1] sm:$0xff pattern:$0x75316420]  ;;  %v245_v15 = vld.sshfl [vmem:[#allocation1 + $0x8] sm:$0xff pattern:$0x75316420] }
  0x43   : > { %402 = vmatpush.msk.msra.mxu2 %vm255_vm1, %v244_v14  ;;  %246 = vst [vmem:[#allocation1] ss:$2 sm:$0xff] %v163_v0  ;;  %404 = vmatpush.msk.msra.mxu3 %vm255_vm1, %v245_v15 }
  0x4a   : > { %v248_v30 = vld.sshfl [vmem:[#allocation1 + $0x8] sm:$0xff pattern:$0x75316420]  ;;  %v247_v31 = vld.sshfl [vmem:[#allocation1] sm:$0xff pattern:$0x75316420] }
  0xbb   : > { %v192_v5 = vpop.f32.mrf.mxu0  ;;  %v212_v6 = vpop.f32.mrf.mxu1 }
  0xbc   : > { %v213_v7 = vadd.f32 %v212_v6, %v192_v5 }
  0xbe   : > { %v217_v8 = vsel %vm216_vm0, %v213_v7, inf }
  0xbf   : > { %218 = vmin.xlane.f32.xlu0 %v217_v8 }
 0x132   : > { %v219_v9 = vpop.xlane.xlu0 %218 }
 0x133   : > { %v220_v10 = vsub.f32 %v219_v9, %v213_v7 }
 0x135   : > { %v221_v11 = vmul.f32 1.442695, %v220_v10 }
 0x137   : > { %459 = vpow2.f32 %v221_v11 }
 0x13d   : > { %v460_v12 = vpop.eup %459 }
 0x13e   : > { %v223_v13 = vsel %vm216_vm0, %v460_v12, 0.0 }
 0x13f   : > { %224 = vadd.xlane.f32.xlu0 %v223_v13 }
 0x1b2   : > { %v225_v16 = vpop.xlane.xlu0 %224 }
 0x1b3   : > { %461 = vrcp.f32 %v225_v16  ;;  %v237_v20 = vand.u32 2147483648, %v225_v16  ;;  %v235_v22 = vand.u32 2147483647, %v225_v16  ;;  %vm231_vm3 = vweird.f32 %v225_v16 }
 0x1b5   : > { %v238_v24 = vor.u32 1.1754944e-38, %v237_v20  ;;  %vm236_vm5 = vcmp.eq.f32.partialorder %v235_v22, 8.507059e+37 }
 0x1b9   : > { %v462_v17 = vpop.eup %461 }
 0x1ba   : > { %v227_v18 = vmul.f32 %v462_v17, %v225_v16  ;;  %vm232_vm2 = vweird.f32 %v462_v17 }
 0x1bb   : > { %vm233_vm4 = vmor %vm231_vm3, %vm232_vm2 }
 0x1bc   : > { %v228_v19 = vsub.f32 1.0, %v227_v18 }
 0x1be   : > { %v229_v21 = vmul.f32 %v462_v17, %v228_v19 }
 0x1c0   : > { %v230_v23 = vadd.f32 %v462_v17, %v229_v21 }
 0x1c2   : > { %v234_v25 = vsel %vm233_vm4, %v462_v17, %v230_v23 }
 0x1c3   : > { %v239_v26 = vsel %vm236_vm5, %v238_v24, %v234_v25 }
 0x1c4   : > { %v240_v28 = vmul.f32 %v460_v12, %v239_v26 }
 0x1c6   : > { %v242_v29 = vmul.f32 %v241_v27, %v240_v28 }
 0x1c8   : > { %403 = vmatmul.msk.f32.vlgmr.msra.gmra.mxu2 %vm251_vm6, %v242_v29  ;;  %405 = vmatmul.msk.f32.vlgmr.msra.gmra.mxu3 %vm251_vm6, %v242_v29 }
 0x24b   : > { %v277_v32 = vpop.f32.mrf.mxu2  ;;  %v297_v33 = vpop.f32.mrf.mxu3 }
 0x24c   : > { %v298_v34 = vadd.f32 %v297_v33, %v248_v30  ;;  %v278_v35 = vadd.f32 %v277_v32, %v247_v31 }
 0x24e   : > { %v302_v36 = vrot.slane %v298_v34, 4 }
 0x250   : > { %v303_v37 = vsel %vm255_vm1, %v278_v35, %v302_v36 }
 0x251   : > { %305 = vst [vmem:[%s162_s3] sm:$0xff] %v303_v37 }
 0x252   : > { %520 = shalt.err (!%p517_p4)
}
 0x253   : > { %415 = dma.vmem_to_hbm [thread:$0]  (%p629_p11), %s321_s4, 128, %s323_s5, %s307_s1  }
 0x254 PF: > { %s334_s18 = sand.u32 1, %s547_s11   ;;  %p721_p7 = scmp.ge.s32.totalorder %s559_s14, 2 }
 0x255   : > { %s335_s20 = scalar_lea.sflag [#allocation5], %s334_s18 }
 0x256   : > { %p422_p5 = pnand %p721_p7, %p633_p12 }
 0x258   : > { %p423_p8 = pneg %p422_p5 }
 0x25a   : > { %542 = dma.done.wait (%p423_p8), %s335_s20, 128  }
 0x25b   : > { %544 = vsyncadd (%p423_p8), %s335_s20, 4294967168  ;;  %p16_p10 = scmp.ge.s32.totalorder %s604_s16, 4   ;;  %s722_s11 = smov %s551_s12 }
 0x25c   : > { %s723_s12 = smov %s555_s13  ;;  %s724_s13 = smov %s616_s19 }
 0x25d   : > { %s725_s14 = smov %s604_s16  ;;  %18 = sbr.rel (!%p16_p10) target bundleno = 7 (0x7), region = 73 }
 0x262   :  { %341 = vsyncpa [#allocation4], 1 }
 0x263   :  { %343 = vsyncpa [#allocation4 + $0x1], 1 }
 0x264   :  { %344 = vsyncpa [#allocation5], 1 }
 0x265   :  { %346 = vsyncpa [#allocation5 + $0x1], 1 }

</bundles_post_ra>
